<compile_context>
chip_gen: v7x
topology: tpu7x:2x2x1
jax: 0.10.0
libtpu: 0.0.40
codegen_flags: <defaults>
</compile_context>

<pallas_src>
import functools

import jax
import jax.numpy as jnp
from jax.experimental import pallas as pl
from jax.experimental.pallas import tpu as pltpu


def _round_up(a, b):
    return pl.cdiv(a, b) * b


def _pack_params(params):
    """Pack the 8 PyTorch-layout tensors into one (20, 64) f32 slab.

    Columns: [0:2]=W1, [2:22]=W2, [22:42]=W3, [42]=W4^T,
             [43]=b1, [44]=b2, [45]=b3, [46]=b4, [47:64]=zero pad.
    """
    w1, b1, w2, b2, w3, b3, w4, b4 = params
    cols = [
        w1,                                        # (20, 2)
        w2,                                        # (20, 20)
        w3,                                        # (20, 20)
        w4.T,                                      # (20, 1)
        b1.reshape(20, 1),
        b2.reshape(20, 1),
        b3.reshape(20, 1),
        jnp.broadcast_to(b4.reshape(1, 1), (20, 1)),
    ]
    slab = jnp.concatenate([c.astype(jnp.float32) for c in cols], axis=1)  # (20, 47)
    return jnp.pad(slab, ((0, 0), (0, 64 - slab.shape[1])))                # (20, 64)


def _mlp_kernel(x_ref, p_ref, o_ref, *, tc):
    # Packed params; slice once, outside the sub-chunk loop.
    p = p_ref[...]                       # (20, 64)
    w1a, w1b = p[:, 0:1], p[:, 1:2]      # layer-1 weight columns
    w2 = p[:, 2:22]                      # (20, 20)
    w3 = p[:, 22:42]                     # (20, 20)
    w4 = p[:, 42:43]                     # (20, 1)
    b1 = p[:, 43:44]
    b2 = p[:, 44:45]
    b3 = p[:, 45:46]
    b4 = p[0:1, 46:47]                   # (1, 1)

    n_sub = x_ref.shape[1] // tc         # static: sub-chunks per block

    def body(c, carry):
        s = pl.multiple_of(c * tc, tc)
        x = x_ref[:, pl.ds(s, tc)]                                   # (2, tc)

        # Layer 1: K=2 contraction -> two VPU broadcast FMAs (skip MXU padding).
        h = jnp.tanh(w1a * x[0:1, :] + w1b * x[1:2, :] + b1)         # (20, tc)

        # Layers 2-3: 20x20 matmuls on the MXU, f32 accumulation, lane-dense tanh.
        h = jnp.tanh(jnp.dot(w2, h, preferred_element_type=jnp.float32) + b2)
        h = jnp.tanh(jnp.dot(w3, h, preferred_element_type=jnp.float32) + b3)

        # Layer 4: 1-wide output -> VPU multiply + cross-sublane (XLU) reduce.
        y = jnp.sum(w4 * h, axis=0, keepdims=True) + b4              # (1, tc)
        o_ref[:, pl.ds(s, tc)] = y.astype(o_ref.dtype)
        return carry

    jax.lax.fori_loop(0, n_sub, body, 0, unroll=True)


def _forward_cols(x_cols, p_slab, *, tm, tc):
    """x_cols: (2, N) f32, batch on the last (lane) axis. Returns (1, N) f32."""
    n = x_cols.shape[1]
    # Tile as big as possible to amortize per-step overhead, but keep >= 2 grid
    # steps when there is enough work so v7x's two TensorCores both run.
    tm_eff = min(tm, max(tc, _round_up(pl.cdiv(n, 2), tc)))
    grid = (pl.cdiv(n, tm_eff),)   # ragged tail handled by Pallas block masking

    return pl.pallas_call(
        functools.partial(_mlp_kernel, tc=tc),
        out_shape=jax.ShapeDtypeStruct((1, n), jnp.float32),
        grid_spec=pltpu.PrefetchScalarGridSpec(
            num_scalar_prefetch=0,
            grid=grid,
            in_specs=[
                pl.BlockSpec((2, tm_eff), lambda i: (0, i)),       # x tile, batch on lanes
                pl.BlockSpec(p_slab.shape, lambda i: (0, 0)),      # packed params (no re-DMA)
            ],
            out_specs=pl.BlockSpec((1, tm_eff), lambda i: (0, i)),  # lane-dense output
        ),
        compiler_params=pltpu.CompilerParams(
            dimension_semantics=("parallel",)),
    )(x_cols, p_slab)


@functools.partial(jax.jit, static_argnames=("tm", "tc"))
def inference_net(x, params, *, tm=4096, tc=512):
    """x: (N, 2) float32 (PyTorch layout) -> (N, 1) float32."""
    assert tc % 128 == 0 and tm % tc == 0
    n = x.shape[0]
    p_slab = _pack_params(params)
    # Single layout pass: (N,2) row-major is feature-interleaved, so the
    # batch-on-lanes layout needs exactly one transpose.  Callers holding
    # activations in (2, N) layout can use _forward_cols directly (zero copies).
    x_cols = x.astype(jnp.float32).T                    # (2, N)
    y = _forward_cols(x_cols, p_slab, tm=tm, tc=tc)     # (1, N), exact N (no pad/slice)
    return y.reshape(n, 1)                              # free reshape


def init_params(key):
    """Deterministic init matching PyTorch nn.Linear defaults (PyTorch layout:
    w: (out_features, in_features), b: (out_features,))."""
    dims = [(2, 20), (20, 20), (20, 20), (20, 1)]
    params = []
    for din, dout in dims:
        key, kw, kb = jax.random.split(key, 3)
        bound = 1.0 / (din ** 0.5)
        params.append(jax.random.uniform(kw, (dout, din), jnp.float32, -bound, bound))
        params.append(jax.random.uniform(kb, (dout,), jnp.float32, -bound, bound))
    return tuple(params)


def reference_mlp(x, params):
    """Pure-JAX reference, identical math to the PyTorch forward."""
    w1, b1, w2, b2, w3, b3, w4, b4 = params
    h = jnp.tanh(x @ w1.T + b1)
    h = jnp.tanh(h @ w2.T + b2)
    h = jnp.tanh(h @ w3.T + b3)
    return h @ w4.T + b4


if __name__ == "__main__":
    key = jax.random.PRNGKey(0)
    key, k1, k2 = jax.random.split(key, 3)
    params = init_params(key)

    # N=1000: exercises the adaptive tile (tm_eff=512, grid=2) and the masked
    #         ragged last block (488 valid + 24 dead columns).
    # N=2048: exercises an exactly-divisible multi-step grid (tm_eff=1024, grid=2).
    for kx, n in ((k1, 1000), (k2, 2048)):
        x = jax.random.normal(kx, (n, 2), jnp.float32)
        out = jax.block_until_ready(inference_net(x, params))
        ref = reference_mlp(x, params)
        assert out.shape == (n, 1)
        assert jnp.allclose(out, ref, atol=1e-5, rtol=1e-5), f"mismatch vs reference (N={n})"

    print("KERNEL_OK")
</pallas_src>

<mosaic_0001>
module attributes {stable_mosaic.version = 11 : i64} {
  func.func @_mlp_kernel(%arg0: i32, %arg1: memref<2x512xf32, #tpu.memory_space<vmem>>, %arg2: memref<20x64xf32, #tpu.memory_space<vmem>>, %arg3: memref<1x512xf32, #tpu.memory_space<vmem>>) attributes {dimension_semantics = [#tpu.dimension_semantics<parallel>], iteration_bounds = array<i64: 2>, scalar_prefetch = 0 : i64, scratch_operands = 0 : i64, tpu.core_type = #tpu.core_type<tc>, window_params = [{transform_indices = @transform_0, window_bounds = array<i64: 2, 512>}, {pipeline_mode = #tpu.pipeline_mode<synchronous>, transform_indices = @transform_1, window_bounds = array<i64: 20, 64>}, {transform_indices = @transform_2, window_bounds = array<i64: 1, 512>}]} {
    %c0 = arith.constant 0 : index
    %c0_0 = arith.constant 0 : index
    %0 = vector.load %arg2[%c0, %c0_0] : memref<20x64xf32, #tpu.memory_space<vmem>>, vector<20x64xf32>
    %1 = vector.extract_strided_slice %0 {offsets = [0, 0], sizes = [20, 1], strides = [1, 1]} : vector<20x64xf32> to vector<20x1xf32>
    %2 = vector.extract_strided_slice %0 {offsets = [0, 1], sizes = [20, 1], strides = [1, 1]} : vector<20x64xf32> to vector<20x1xf32>
    %3 = vector.extract_strided_slice %0 {offsets = [0, 2], sizes = [20, 20], strides = [1, 1]} : vector<20x64xf32> to vector<20x20xf32>
    %4 = vector.extract_strided_slice %0 {offsets = [0, 22], sizes = [20, 20], strides = [1, 1]} : vector<20x64xf32> to vector<20x20xf32>
    %5 = vector.extract_strided_slice %0 {offsets = [0, 42], sizes = [20, 1], strides = [1, 1]} : vector<20x64xf32> to vector<20x1xf32>
    %6 = vector.extract_strided_slice %0 {offsets = [0, 43], sizes = [20, 1], strides = [1, 1]} : vector<20x64xf32> to vector<20x1xf32>
    %7 = vector.extract_strided_slice %0 {offsets = [0, 44], sizes = [20, 1], strides = [1, 1]} : vector<20x64xf32> to vector<20x1xf32>
    %8 = vector.extract_strided_slice %0 {offsets = [0, 45], sizes = [20, 1], strides = [1, 1]} : vector<20x64xf32> to vector<20x1xf32>
    %9 = vector.extract_strided_slice %0 {offsets = [0, 46], sizes = [1, 1], strides = [1, 1]} : vector<20x64xf32> to vector<1x1xf32>
    %c0_i32 = arith.constant 0 : i32
    %c512_i32 = arith.constant 512 : i32
    %10 = arith.muli %c0_i32, %c512_i32 : i32
    %11 = tpu.assume_multiple %10, 512 : i32
    %c0_1 = arith.constant 0 : index
    %12 = arith.index_cast %11 : i32 to index
    %13 = vector.load %arg1[%c0_1, %12] : memref<2x512xf32, #tpu.memory_space<vmem>>, vector<2x512xf32>
    %14 = vector.extract_strided_slice %13 {offsets = [0, 0], sizes = [1, 512], strides = [1, 1]} : vector<2x512xf32> to vector<1x512xf32>
    %15 = vector.broadcast %1 : vector<20x1xf32> to vector<20x512xf32>
    %16 = vector.broadcast %14 : vector<1x512xf32> to vector<20x512xf32>
    %17 = arith.mulf %15, %16 : vector<20x512xf32>
    %18 = vector.extract_strided_slice %13 {offsets = [1, 0], sizes = [1, 512], strides = [1, 1]} : vector<2x512xf32> to vector<1x512xf32>
    %19 = vector.broadcast %2 : vector<20x1xf32> to vector<20x512xf32>
    %20 = vector.broadcast %18 : vector<1x512xf32> to vector<20x512xf32>
    %21 = arith.mulf %19, %20 : vector<20x512xf32>
    %22 = arith.addf %17, %21 : vector<20x512xf32>
    %23 = vector.broadcast %6 : vector<20x1xf32> to vector<20x512xf32>
    %24 = arith.addf %22, %23 : vector<20x512xf32>
    %25 = math.tanh %24 : vector<20x512xf32>
    %cst = arith.constant dense<0.000000e+00> : vector<20x512xf32>
    %26 = tpu.matmul %3, %25, %cst {dimension_numbers = #tpu.dot_dimension_numbers<[1], [0], [0], [1], [0, 0, 1, 1], [], []>} : vector<20x20xf32>, vector<20x512xf32>, vector<20x512xf32> -> vector<20x512xf32>
    %27 = vector.broadcast %7 : vector<20x1xf32> to vector<20x512xf32>
    %28 = arith.addf %26, %27 : vector<20x512xf32>
    %29 = math.tanh %28 : vector<20x512xf32>
    %cst_2 = arith.constant dense<0.000000e+00> : vector<20x512xf32>
    %30 = tpu.matmul %4, %29, %cst_2 {dimension_numbers = #tpu.dot_dimension_numbers<[1], [0], [0], [1], [0, 0, 1, 1], [], []>} : vector<20x20xf32>, vector<20x512xf32>, vector<20x512xf32> -> vector<20x512xf32>
    %31 = vector.broadcast %8 : vector<20x1xf32> to vector<20x512xf32>
    %32 = arith.addf %30, %31 : vector<20x512xf32>
    %33 = math.tanh %32 : vector<20x512xf32>
    %34 = vector.broadcast %5 : vector<20x1xf32> to vector<20x512xf32>
    %35 = arith.mulf %34, %33 : vector<20x512xf32>
    %cst_3 = arith.constant dense<0.000000e+00> : vector<512xf32>
    %36 = vector.multi_reduction <add>, %35, %cst_3 [0] : vector<20x512xf32> to vector<512xf32>
    %37 = vector.shape_cast %36 : vector<512xf32> to vector<1x512xf32>
    %38 = vector.broadcast %9 : vector<1x1xf32> to vector<1x512xf32>
    %39 = arith.addf %37, %38 : vector<1x512xf32>
    %c0_4 = arith.constant 0 : index
    %40 = arith.index_cast %11 : i32 to index
    %41 = vector.load %arg3[%c0_4, %40] : memref<1x512xf32, #tpu.memory_space<vmem>>, vector<1x512xf32>
    tpu.vector_store %arg3[%c0_4, %40], %39 {strides = array<i32>} : memref<1x512xf32, #tpu.memory_space<vmem>>, vector<1x512xf32>,
    %c1_i32 = arith.constant 1 : i32
    return
  }
  func.func @transform_0(%arg0: i32) -> (i32, i32) {
    %c0_i32 = arith.constant 0 : i32
    %c0_i32_0 = arith.constant 0 : i32
    return %c0_i32, %arg0 : i32, i32
  }
  func.func @transform_1(%arg0: i32) -> (i32, i32) {
    %c0_i32 = arith.constant 0 : i32
    %c0_i32_0 = arith.constant 0 : i32
    %c0_i32_1 = arith.constant 0 : i32
    return %c0_i32, %c0_i32_0 : i32, i32
  }
  func.func @transform_2(%arg0: i32) -> (i32, i32) {
    %c0_i32 = arith.constant 0 : i32
    %c0_i32_0 = arith.constant 0 : i32
    return %c0_i32, %arg0 : i32, i32
  }
}

</mosaic_0001>

<bundles_post_ra>
// kernel: inference_net.1
= control target key start
LH: loop header
LB: loop body
LE: loop exit
PB: predicated region body
PF: predicated region fallthrough
CT: control target
= control target key end

     0   :  { %7 = vsyncpa [#allocation3], 0  ;;  %s1392_s0 = inlined_call_operand.vmem [shape: f32[2,1000], index: 0, kind: input, shape index: {}]   ;;  %s1393_s1 = inlined_call_operand.vmem [shape: f32[20,64], index: 1, kind: input, shape index: {}]   ;;  %s1394_s2 = inlined_call_operand.hbm [shape: f32[1,1000], index: 2, kind: output, shape index: {}]  }
   0x1   :  { %9 = vsyncpa [#allocation3 + $0x1], 0  ;;  %s1204_s9 = smov 0   ;;  %s1206_s10 = smov 0  }
   0x2   :  { %s1208_s11 = smov 0   ;;  %s1210_s12 = smov 0  }
   0x3 LB: > { %s1225_s13 = sadd.s32 4294967295, %s1175_s12   ;;  %s927_s14 = sadd.s32 4294967294, %s1175_s12   ;;  %s1175_s12 = sphi %s1210_s12, %s1400_s12   ;;  %s1171_s11 = sphi %s1208_s11, %s1399_s11   ;;  %s1167_s10 = sphi %s1206_s10, %s1398_s10   ;;  %s1163_s9 = sphi %s1204_s9, %s1397_s9  }
   0x4   : > { %s1229_s15 = sadd.s32 1, %s1175_s12   ;;  %s69_s16 = sadd.s32 1, %s1171_s11 }
   0x5   : > { %s66_s17 = ssub.s32 %s1175_s12, %s1229_s15  ;;  %p79_p0 = scmp.ne.s32.totalorder %s1171_s11, %s1167_s10 }
   0x6   : > { %p67_p1 = scmp.eq.s32.totalorder %s66_s17, 0  ;;  %p80_p2 = scmp.eq.s32.totalorder %s1225_s13, 1 }
   0x7   : > { %p85_p3 = scmp.ne.s32.totalorder %s1167_s10, %s1163_s9  ;;  %p86_p4 = scmp.eq.s32.totalorder %s927_s14, 1 }
   0x8   : > { %s1240_s18 = scalar_select %p67_p1, %s1171_s11, %s69_s16  }
   0x9   : > { %p1242_p5 = por %p80_p2, %p79_p0  ;;  %p1246_p6 = por %p86_p4, %p85_p3 }
   0xa   : > { %p930_p7 = scmp.ge.s32.totalorder %s1175_s12, 1  ;;  %p116_p8 = scmp.lt.s32.totalorder %s1175_s12, 3 }
   0xc   : > { %p117_p9 = pnand %p930_p7, %p116_p8 }
   0xd   : > { %v1255_v0 = vld [vmem:[%s1393_s1] sm:$0xff] (!%p117_p9)  ;;  %v1177_v1 = vmov (!%p117_p9), 1   ;;  %v1178_v2 = vmov (!%p117_p9), 0   ;;  %v1262_v3 = vld [vmem:[%s1393_s1 + $0x8] sm:$0xff] (!%p117_p9)  ;;  %v1179_v4 = vmov (!%p117_p9), 43   ;;  %s1180_s27 = smov (!%p117_p9), 126   ;;  %v165_v8 = vlaneseq (!%p117_p9) }
   0xe   : > { %120 = sbr.rel (%p117_p9) target bundleno = 693 (0x2b5), region = 28  ;;  %1027 = vset.pattern.permute.xlu1 (!%p117_p9), %v1177_v1  ;;  %1026 = vset.pattern.permute.xlu0 (!%p117_p9), %v1178_v2  ;;  %v1271_v5 = vld [vmem:[%s1393_s1 + $0x10] sm:$0xf] (!%p117_p9)  ;;  %v1181_v6 = vmov (!%p117_p9), 0.0   ;;  %v1182_v7 = vmov (!%p117_p9), 44   ;;  %s1183_s28 = smov (!%p117_p9), 106  }
   0xf   : > { %214 = vperm.xlu1 (!%p117_p9), %1027, %v1255_v0   ;;  %151 = vperm.xlu0 (!%p117_p9), %1026, %v1255_v0   ;;  %s932_s29 = sshll.u32 (!%p117_p9), %s1225_s13, 2  ;;  %v1289_v9 = vshrl.u32 (!%p117_p9), %v165_v8, 7  ;;  %vm346_vm0 = vcmask (!%p117_p9), 1043456   ;;  %vm339_vm1 = vcmask (!%p117_p9), 162816   ;;  %s135_s6 = sand.u32 (!%p117_p9), 1, %s1167_s10   ;;  %vm850_vm2 = vcmp.lt.s32.totalorder (!%p117_p9), %v165_v8, 512 }
  0x10   : > { %423 = vmatprep.mubr.f32.mxu0 (!%p117_p9), %v1181_v6  ;;  %506 = vmatprep.mubr.f32.mxu1 (!%p117_p9), %v1181_v6  ;;  %p139_p10 = scmp.lt.s32.totalorder (!%p117_p9), %s932_s29, 7  ;;  %s931_s7 = sshll.u32 (!%p117_p9), %s135_s6, 2 }
  0x11   : > { %v227_v10 = vsub.s32 (!%p117_p9), 1, %v1289_v9  ;;  %v231_v11 = vsub.s32 (!%p117_p9), 3, %v1289_v9  ;;  %v235_v12 = vsub.s32 (!%p117_p9), 5, %v1289_v9  ;;  %v167_v13 = vsub.s32 (!%p117_p9), 0, %v1289_v9  ;;  %s959_s8 = sshll.u32 (!%p117_p9), %s1225_s13, 6  ;;  %s137_s14 = scalar_lea.vmem (!%p117_p9), [#allocation2], %s931_s7 }
  0x12   : > { %v239_v15 = vsub.s32 (!%p117_p9), 7, %v1289_v9  ;;  %v171_v16 = vsub.s32 (!%p117_p9), 2, %v1289_v9  ;;  %v175_v17 = vsub.s32 (!%p117_p9), 4, %v1289_v9  ;;  %v179_v18 = vsub.s32 (!%p117_p9), 6, %v1289_v9  ;;  %s868_s16 = sshll.u32 (!%p117_p9), %s137_s14, 4  ;;  %s1350_s22 = scalar_lea.hbm (!%p117_p9), %s1394_s2, %s959_s8  ;;  %s1352_s16 = int_to_ptr.vmem [resolvable:$true] %s868_s16 }
  0x13   : > { %218 = vperm.xlu1 (!%p117_p9), %1027, %v1262_v3   ;;  %156 = vperm.xlu0 (!%p117_p9), %1026, %v1262_v3   ;;  %s854_s23 = scalar_lea.sflag (!%p117_p9), [#allocation3], %s135_s6  ;;  %s1113_s24 = scalar_lea.vmem (!%p117_p9), %s1352_s16, 64 }
  0x14   : > { %p1114_p11 = scmp.ne.s32.totalorder (!%p117_p9), %s1352_s16, %s1113_s24  ;;  %s1188_s13 = smov (!%p117_p9), [#allocation2]  }
  0x15   : > { %s1402_s29 = smov (!%p139_p10, %s932_s29), 7  ;;  %s1117_s25 = sshll.u32 %s1188_s13, 4  ;;  %s1118_s25 = int_to_ptr.vmem [resolvable:$false] %s1117_s25 }
  0x16   : > { %s933_s30 = sshll.u32 %s1402_s29, 1  ;;  %p1115_p12 = pnand %p1114_p11, %p1242_p5 }
  0x17   : > { %1029 = vset.pattern.permute.xlu1 %v1179_v4  ;;  %1028 = vset.pattern.permute.xlu0 %v1179_v4  ;;  %s142_s5 = scalar_lea.vmem %s1392_s0, %s933_s30  ;;  %s1119_s26 = scalar_lea.vmem %s1118_s25, 128 }
  0x18   : > { %290 = vperm.xlu1 %1029, %v1262_v3   ;;  %286 = vperm.xlu0 %1028, %v1255_v0   ;;  %v148_v14 = vld [vmem:[%s142_s5] sm:$0xff]  ;;  %p1116_p13 = pneg %p1115_p12  ;;  %p1120_p0 = scmp.lt.s32.totalorder %s1352_s16, %s1118_s25 }
  0x19   : > { %v228_v19 = vrot.slane %v148_v14, %v227_v10  ;;  %v232_v20 = vrot.slane %v148_v14, %v231_v11  ;;  %v236_v21 = vrot.slane %v148_v14, %v235_v12  ;;  %v168_v22 = vrot.slane %v148_v14, %v167_v13  ;;  %p1121_p1 = scmp.lt.s32.totalorder %s1119_s26, %s1113_s24 }
  0x1a   : > { %v240_v23 = vrot.slane %v148_v14, %v239_v15  ;;  %v172_v24 = vrot.slane %v148_v14, %v171_v16  ;;  %v176_v25 = vrot.slane %v148_v14, %v175_v17  ;;  %v180_v26 = vrot.slane %v148_v14, %v179_v18 }
  0x1b   : > { %v248_v28 = vrot.slane %v228_v19, %v227_v10  ;;  %v252_v29 = vrot.slane %v232_v20, %v227_v10  ;;  %v256_v30 = vrot.slane %v236_v21, %v227_v10  ;;  %v188_v32 = vrot.slane %v168_v22, %v167_v13  ;;  %p1122_p2 = por %p1121_p1, %p1120_p0 }
  0x1c   : > { %1030 = vset.pattern.permute.xlu1 %v1178_v2  ;;  %1031 = vset.pattern.permute.xlu0 %v1177_v1  ;;  %v260_v33 = vrot.slane %v240_v23, %v227_v10  ;;  %v192_v34 = vrot.slane %v172_v24, %v167_v13  ;;  %v196_v35 = vrot.slane %v176_v25, %v167_v13 }
  0x1d   : > { %161 = vperm.xlu1 %1030, %v1271_v5   ;;  %222 = vperm.xlu0 %1031, %v1271_v5   ;;  %v200_v36 = vrot.slane %v180_v26, %v167_v13  ;;  %p1123_p3 = pnand %p1122_p2, %p1116_p13 }
  0x21   : > { %1032 = vset.pattern.permute.xlu1 %v1179_v4  ;;  %335 = vrot.lane.b32.xlu0 %v1262_v3, %s1180_s27 }
  0x22   : > { %294 = vperm.xlu1 %1032, %v1271_v5   ;;  %1033 = vset.pattern.permute.xlu0 %v1182_v7 }
  0x25   : > { %322 = vperm.xlu0 %1033, %v1255_v0  }
  0x26   : > { %333 = vrot.lane.b32.xlu1 %v1255_v0, %s1180_s27 }
  0x27   : > { %1034 = vset.pattern.permute.xlu1 %v1182_v7 }
  0x29   : > { %549 = vrot.lane.b32.xlu0 %v1255_v0, %s1183_s28 }
  0x2a   : > { %337 = vrot.lane.b32.xlu1 %v1271_v5, %s1180_s27 }
  0x2d   : > { %553 = vrot.lane.b32.xlu0 %v1271_v5, %s1183_s28 }
  0x2e   : > { %326 = vperm.xlu1 %1034, %v1262_v3  }
  0x32   : > { %330 = vperm.xlu1 %1034, %v1271_v5  }
  0x36   : > { %551 = vrot.lane.b32.xlu1 %v1262_v3, %s1183_s28 }
  0x8e   : > { %v215_v27 = vpop.permute.xlu1 %214  ;;  %v152_v31 = vpop.permute.xlu0 %151 }
  0x8f   : > { %v261_v37 = vmul.f32 %v248_v28, %v215_v27  ;;  %v262_v38 = vmul.f32 %v252_v29, %v215_v27  ;;  %v263_v39 = vmul.f32 %v256_v30, %v215_v27  ;;  %v201_v40 = vmul.f32 %v188_v32, %v152_v31 }
  0x90   : > { %v264_v51 = vmul.f32 %v260_v33, %v215_v27  ;;  %v202_v52 = vmul.f32 %v192_v34, %v152_v31  ;;  %v203_v53 = vmul.f32 %v196_v35, %v152_v31  ;;  %v204_v54 = vmul.f32 %v200_v36, %v152_v31 }
  0x91   : > { %v273_v1 = vadd.f32 %v261_v37, %v201_v40 }
  0x92   : > { %v219_v41 = vpop.permute.xlu1 %218  ;;  %v157_v42 = vpop.permute.xlu0 %156  ;;  %v274_v4 = vadd.f32 %v262_v38, %v202_v52  ;;  %v275_v7 = vadd.f32 %v263_v39, %v203_v53  ;;  %v276_v10 = vadd.f32 %v264_v51, %v204_v54  ;;  %v1184_v53 = vmov 45  }
  0x93   : > { %v265_v43 = vmul.f32 %v248_v28, %v219_v41  ;;  %v266_v44 = vmul.f32 %v252_v29, %v219_v41  ;;  %v267_v45 = vmul.f32 %v256_v30, %v219_v41  ;;  %v268_v46 = vmul.f32 %v260_v33, %v219_v41  ;;  %1035 = vset.pattern.permute.xlu1 %v1184_v53 }
  0x94   : > { %v205_v47 = vmul.f32 %v188_v32, %v157_v42  ;;  %v206_v48 = vmul.f32 %v192_v34, %v157_v42  ;;  %v207_v49 = vmul.f32 %v196_v35, %v157_v42  ;;  %v208_v50 = vmul.f32 %v200_v36, %v157_v42  ;;  %1036 = vset.pattern.permute.xlu0 %v1184_v53 }
  0x95   : > { %538 = vperm.xlu1 %1035, %v1255_v0   ;;  %542 = vperm.xlu0 %1036, %v1262_v3   ;;  %v1185_v54 = vmov 42  }
  0x96   : > { %v277_v55 = vadd.f32 %v265_v43, %v205_v47  ;;  %v278_v56 = vadd.f32 %v266_v44, %v206_v48  ;;  %v279_v57 = vadd.f32 %v267_v45, %v207_v49  ;;  %v280_v58 = vadd.f32 %v268_v46, %v208_v50 }
  0x97   : > { %v291_v59 = vpop.permute.xlu1 %290  ;;  %v287_v60 = vpop.permute.xlu0 %286 }
  0x98   : > { %v301_v61 = vadd.f32 %v291_v59, %v277_v55  ;;  %v302_v62 = vadd.f32 %v291_v59, %v278_v56  ;;  %v303_v63 = vadd.f32 %v291_v59, %v279_v57  ;;  %v304_v2 = vadd.f32 %v291_v59, %v280_v58 }
  0x99   : > { %v297_v11 = vadd.f32 %v287_v60, %v273_v1  ;;  %v298_v12 = vadd.f32 %v287_v60, %v274_v4  ;;  %v299_v13 = vadd.f32 %v287_v60, %v275_v7  ;;  %v300_v14 = vadd.f32 %v287_v60, %v276_v10  ;;  %546 = vperm.xlu1 %1035, %v1271_v5  }
  0x9a   : > { %1041 = vtanh.f32 %v301_v61  ;;  %1038 = vset.pattern.permute.xlu0 %v1185_v54  ;;  %v1186_v55 = vmov 46  }
  0x9b   : > { %1043 = vtanh.f32 %v302_v62  ;;  %756 = vperm.xlu0 %1038, %v1262_v3  }
  0x9c   : > { %1045 = vtanh.f32 %v303_v63  ;;  %v162_v15 = vpop.permute.xlu1 %161  ;;  %v223_v16 = vpop.permute.xlu0 %222 }
  0x9d   : > { %1047 = vtanh.f32 %v304_v2  ;;  %v209_v17 = vmul.f32 %v188_v32, %v162_v15  ;;  %v210_v18 = vmul.f32 %v192_v34, %v162_v15  ;;  %v211_v19 = vmul.f32 %v196_v35, %v162_v15  ;;  %1037 = vset.pattern.permute.xlu1 %v1185_v54 }
  0x9e   : > { %1049 = vtanh.f32 %v297_v11  ;;  %v212_v20 = vmul.f32 %v200_v36, %v162_v15  ;;  %v269_v21 = vmul.f32 %v248_v28, %v223_v16  ;;  %v270_v22 = vmul.f32 %v252_v29, %v223_v16  ;;  %752 = vperm.xlu1 %1037, %v1255_v0  }
  0x9f   : > { %1051 = vtanh.f32 %v298_v12  ;;  %v271_v23 = vmul.f32 %v256_v30, %v223_v16  ;;  %v272_v24 = vmul.f32 %v260_v33, %v223_v16  ;;  %1040 = vset.pattern.permute.xlu0 %v1186_v55 }
  0xa0   : > { %1053 = vtanh.f32 %v299_v13  ;;  %v281_v25 = vadd.f32 %v269_v21, %v209_v17  ;;  %v282_v26 = vadd.f32 %v270_v22, %v210_v18  ;;  %v336_v51 = vpop.permute.xlu0 %335 }
  0xa1   : > { %1055 = vtanh.f32 %v300_v14  ;;  %v295_v27 = vpop.permute.xlu1 %294  ;;  %v283_v31 = vadd.f32 %v271_v23, %v211_v19  ;;  %v284_v37 = vadd.f32 %v272_v24, %v212_v20 }
  0xa2   : > { %v305_v38 = vadd.f32 %v295_v27, %v281_v25  ;;  %v306_v39 = vadd.f32 %v295_v27, %v282_v26  ;;  %760 = vperm.xlu1 %1037, %v1271_v5  }
  0xa3   : > { %v307_v40 = vadd.f32 %v295_v27, %v283_v31  ;;  %v308_v32 = vadd.f32 %v295_v27, %v284_v37 }
  0xa4   : > { %v1042_v34 = vpop.eup %1041  ;;  %1057 = vtanh.f32 %v305_v38  ;;  %v323_v56 = vpop.permute.xlu0 %322 }
  0xa5   : > { %v1044_v35 = vpop.eup %1043  ;;  %1059 = vtanh.f32 %v306_v39  ;;  %v334_v48 = vpop.permute.xlu1 %333 }
  0xa6   : > { %v1046_v28 = vpop.eup %1045  ;;  %1061 = vtanh.f32 %v307_v40  ;;  %1039 = vset.pattern.permute.xlu1 %v1186_v55 }
  0xa7   : > { %v1048_v29 = vpop.eup %1047  ;;  %1063 = vtanh.f32 %v308_v32  ;;  %812 = vperm.xlu1 %1039, %v1255_v0  }
  0xa8   : > { %v1050_v30 = vpop.eup %1049 }
  0xa9   : > { %v1052_v33 = vpop.eup %1051  ;;  %v962_v36 = vpack.c.bf16 %v1042_v34, %v1050_v30  ;;  %v338_v52 = vpop.permute.xlu1 %337 }
  0xaa   : > { %v1054_v41 = vpop.eup %1053  ;;  %v960_v42 = vpack.c.bf16 %v1044_v35, %v1052_v33 }
  0xab   : > { %v1056_v43 = vpop.eup %1055  ;;  %v966_v44 = vpack.c.bf16 %v1046_v28, %v1054_v41  ;;  %v550_v28 = vpop.permute.xlu0 %549 }
  0xac   : > { %961 = vmatprep.subr.bf16.mxu0 %v960_v42  ;;  %v964_v45 = vpack.c.bf16 %v1048_v29, %v1056_v43 }
  0xad   : > { %963 = vmatpush1.bf16.msra.mxu0 %v962_v36  ;;  %v327_v63 = vpop.permute.xlu1 %326 }
  0xae   : > { %v1058_v46 = vpop.eup %1057  ;;  %965 = vmatprep.subr.bf16.mxu1 %v964_v45 }
  0xaf   : > { %v1060_v47 = vpop.eup %1059  ;;  %967 = vmatpush1.bf16.msra.mxu1 %v966_v44  ;;  %v554_v36 = vpop.permute.xlu0 %553 }
  0xb0   : > { %v1062_v49 = vpop.eup %1061  ;;  %934 = vmatprep.subr.msk.mxu0 %vm346_vm0, %v1060_v47 }
  0xb1   : > { %v1064_v50 = vpop.eup %1063  ;;  %935 = vmatpush1.msk.msra.mxu0 %vm346_vm0, %v1058_v46  ;;  %v331_v14 = vpop.permute.xlu1 %330 }
  0xb2   : > { %939 = vmatprep.subr.msk.mxu1 %vm346_vm0, %v1064_v50  ;;  %936 = vmatmul.mubr.msk.f32.vlgmr.msra.gmra.mrb[0].mxu0 %vm339_vm1, %v334_v48 }
  0xb3   : > { %940 = vmatpush1.msk.msra.mxu1 %vm346_vm0, %v1062_v49  ;;  %429 = vmatprep.mubr.f32.mxu0 %v1181_v6 }
  0xb4   : > { %941 = vmatmul.mubr.msk.f32.vlgmr.msra.gmra.mrb[0].mxu1 %vm339_vm1, %v334_v48 }
  0xb5   : > { %512 = vmatprep.mubr.f32.mxu1 %v1181_v6  ;;  %v552_v33 = vpop.permute.xlu1 %551 }
  0xb6   : > { %937 = vmatmul.mubr.msk.f32.gmra.mrb[2].mxu0 %vm339_vm1, %v336_v51 }
  0xb7   : > { %435 = vmatprep.mubr.f32.mxu0 %v1181_v6 }
  0xb8   : > { %942 = vmatmul.mubr.msk.f32.gmra.mrb[2].mxu1 %vm339_vm1, %v336_v51 }
  0xb9   : > { %518 = vmatprep.mubr.f32.mxu1 %v1181_v6 }
  0xba   : > { %938 = vmatmul.mubr.msk.f32.gmra.mrb[4].mxu0 %vm339_vm1, %v338_v52 }
  0xbb   : > { %637 = vmatprep.mubr.f32.mxu0 %v1181_v6 }
  0xbc   : > { %943 = vmatmul.mubr.msk.f32.gmra.mrb[4].mxu1 %vm339_vm1, %v338_v52 }
  0xbd   : > { %720 = vmatprep.mubr.f32.mxu1 %v1181_v6 }
 0x114   : > { %v539_v41 = vpop.permute.xlu1 %538  ;;  %v543_v47 = vpop.permute.xlu0 %542 }
 0x185   : > { %v425_v57 = vpop.f32.mrb[0].mxu0 }
 0x186   : > { %v426_v58 = vadd.f32 %v425_v57, %v323_v56  ;;  %v427_v59 = vpop.f32.mrb[1].mxu0 }
 0x187   : > { %v508_v60 = vpop.f32.mrb[0].mxu1  ;;  %v428_v61 = vadd.f32 %v427_v59, %v323_v56 }
 0x188   : > { %1065 = vtanh.f32 %v426_v58  ;;  %v509_v62 = vadd.f32 %v508_v60, %v323_v56  ;;  %v510_v3 = vpop.f32.mrb[1].mxu1  ;;  %v547_v58 = vpop.permute.xlu1 %546 }
 0x189   : > { %1067 = vtanh.f32 %v428_v61  ;;  %v511_v1 = vadd.f32 %v510_v3, %v323_v56  ;;  %v431_v2 = vpop.f32.mrb[2].mxu0 }
 0x18a   : > { %1069 = vtanh.f32 %v509_v62  ;;  %v432_v4 = vadd.f32 %v431_v2, %v327_v63  ;;  %v433_v7 = vpop.f32.mrb[3].mxu0 }
 0x18b   : > { %1071 = vtanh.f32 %v511_v1  ;;  %v514_v5 = vpop.f32.mrb[2].mxu1  ;;  %v434_v10 = vadd.f32 %v433_v7, %v327_v63 }
 0x18c   : > { %1073 = vtanh.f32 %v432_v4  ;;  %v515_v0 = vadd.f32 %v514_v5, %v327_v63  ;;  %v516_v11 = vpop.f32.mrb[3].mxu1 }
 0x18d   : > { %1075 = vtanh.f32 %v434_v10  ;;  %v517_v12 = vadd.f32 %v516_v11, %v327_v63  ;;  %v437_v13 = vpop.f32.mrb[4].mxu0  ;;  %v753_v10 = vpop.permute.xlu1 %752 }
 0x18e   : > { %1077 = vtanh.f32 %v515_v0  ;;  %v439_v15 = vpop.f32.mrb[5].mxu0  ;;  %v438_v18 = vadd.f32 %v437_v13, %v331_v14  ;;  %v757_v0 = vpop.permute.xlu0 %756 }
 0x18f   : > { %1079 = vtanh.f32 %v517_v12  ;;  %v520_v16 = vpop.f32.mrb[4].mxu1  ;;  %v440_v17 = vadd.f32 %v439_v15, %v331_v14 }
 0x190   : > { %v522_v19 = vpop.f32.mrb[5].mxu1  ;;  %v521_v22 = vadd.f32 %v520_v16, %v331_v14 }
 0x191   : > { %1081 = vtanh.f32 %v440_v17  ;;  %v523_v20 = vadd.f32 %v522_v19, %v331_v14 }
 0x192   : > { %v1066_v21 = vpop.eup %1065 }
 0x193   : > { %v1068_v23 = vpop.eup %1067  ;;  %1083 = vtanh.f32 %v523_v20 }
 0x194   : > { %v1070_v24 = vpop.eup %1069  ;;  %1085 = vtanh.f32 %v438_v18 }
 0x195   : > { %v1072_v25 = vpop.eup %1071  ;;  %1087 = vtanh.f32 %v521_v22 }
 0x196   : > { %v1074_v26 = vpop.eup %1073 }
 0x197   : > { %v1076_v27 = vpop.eup %1075  ;;  %v970_v31 = vpack.c.bf16 %v1074_v26, %v1066_v21 }
 0x198   : > { %v1078_v37 = vpop.eup %1077  ;;  %v968_v38 = vpack.c.bf16 %v1076_v27, %v1068_v23  ;;  %v761_v27 = vpop.permute.xlu1 %760 }
 0x199   : > { %v1080_v39 = vpop.eup %1079  ;;  %v974_v40 = vpack.c.bf16 %v1078_v37, %v1070_v24 }
 0x19a   : > { %969 = vmatprep.subr.bf16.mxu0 %v968_v38  ;;  %v972_v32 = vpack.c.bf16 %v1080_v39, %v1072_v25 }
 0x19b   : > { %v1082_v34 = vpop.eup %1081  ;;  %971 = vmatpush1.bf16.msra.mxu0 %v970_v31 }
 0x19c   : > { %973 = vmatprep.subr.bf16.mxu1 %v972_v32  ;;  %944 = vmatprep.subr.msk.mxu0 %vm346_vm0, %v1082_v34 }
 0x19d   : > { %v1084_v35 = vpop.eup %1083  ;;  %975 = vmatpush1.bf16.msra.mxu1 %v974_v40 }
 0x19e   : > { %v1086_v29 = vpop.eup %1085  ;;  %949 = vmatprep.subr.msk.mxu1 %vm346_vm0, %v1084_v35 }
 0x19f   : > { %945 = vmatpush1.msk.msra.mxu0 %vm346_vm0, %v1086_v29  ;;  %v1088_v30 = vpop.eup %1087 }
 0x1a0   : > { %946 = vmatmul.mubr.msk.f32.vlgmr.msra.gmra.mrb[6].mxu0 %vm339_vm1, %v550_v28 }
 0x1a1   : > { %950 = vmatpush1.msk.msra.mxu1 %vm346_vm0, %v1088_v30  ;;  %643 = vmatprep.mubr.f32.mxu0 %v1181_v6 }
 0x1a2   : > { %951 = vmatmul.mubr.msk.f32.vlgmr.msra.gmra.mrb[6].mxu1 %vm339_vm1, %v550_v28 }
 0x1a3   : > { %726 = vmatprep.mubr.f32.mxu1 %v1181_v6 }
 0x1a4   : > { %947 = vmatmul.mubr.msk.f32.gmra.mrb[8].mxu0 %vm339_vm1, %v552_v33 }
 0x1a5   : > { %649 = vmatprep.mubr.f32.mxu0 %v1181_v6 }
 0x1a6   : > { %952 = vmatmul.mubr.msk.f32.gmra.mrb[8].mxu1 %vm339_vm1, %v552_v33 }
 0x1a7   : > { %732 = vmatprep.mubr.f32.mxu1 %v1181_v6 }
 0x1a8   : > { %948 = vmatmul.mubr.msk.f32.gmra.mrb[10].mxu0 %vm339_vm1, %v554_v36 }
 0x1aa   : > { %953 = vmatmul.mubr.msk.f32.gmra.mrb[10].mxu1 %vm339_vm1, %v554_v36 }
 0x273   : > { %v639_v42 = vpop.f32.mrb[6].mxu0 }
 0x274   : > { %v640_v43 = vadd.f32 %v639_v42, %v539_v41  ;;  %v641_v44 = vpop.f32.mrb[7].mxu0 }
 0x275   : > { %v722_v45 = vpop.f32.mrb[6].mxu1  ;;  %v642_v46 = vadd.f32 %v641_v44, %v539_v41 }
 0x276   : > { %1089 = vtanh.f32 %v640_v43  ;;  %v723_v48 = vadd.f32 %v722_v45, %v539_v41  ;;  %v724_v49 = vpop.f32.mrb[7].mxu1 }
 0x277   : > { %1091 = vtanh.f32 %v642_v46  ;;  %v725_v50 = vadd.f32 %v724_v49, %v539_v41  ;;  %v645_v51 = vpop.f32.mrb[8].mxu0 }
 0x278   : > { %1093 = vtanh.f32 %v723_v48  ;;  %v646_v52 = vadd.f32 %v645_v51, %v543_v47  ;;  %v647_v6 = vpop.f32.mrb[9].mxu0 }
 0x279   : > { %1095 = vtanh.f32 %v725_v50  ;;  %v728_v53 = vpop.f32.mrb[8].mxu1  ;;  %v648_v54 = vadd.f32 %v647_v6, %v543_v47  ;;  %v1187_v6 = vmov 1966171168  }
 0x27a   : > { %v729_v55 = vadd.f32 %v728_v53, %v543_v47  ;;  %1097 = vtanh.f32 %v646_v52  ;;  %v730_v56 = vpop.f32.mrb[9].mxu1  ;;  %v826_v53 = vunpack.c.l.s4 %v1187_v6 }
 0x27b   : > { %1099 = vtanh.f32 %v648_v54  ;;  %v731_v57 = vadd.f32 %v730_v56, %v543_v47  ;;  %v651_v59 = vpop.f32.mrb[10].mxu0 }
 0x27c   : > { %1101 = vtanh.f32 %v729_v55  ;;  %v652_v60 = vadd.f32 %v651_v59, %v547_v58  ;;  %v653_v61 = vpop.f32.mrb[11].mxu0 }
 0x27d   : > { %1103 = vtanh.f32 %v731_v57  ;;  %v734_v62 = vpop.f32.mrb[10].mxu1  ;;  %v654_v63 = vadd.f32 %v653_v61, %v547_v58 }
 0x27e   : > { %1105 = vtanh.f32 %v652_v60  ;;  %v735_v3 = vadd.f32 %v734_v62, %v547_v58  ;;  %v736_v1 = vpop.f32.mrb[11].mxu1  ;;  %v827_v62 = vunpack.c.0.s8 %v826_v53 }
 0x27f   : > { %1107 = vtanh.f32 %v654_v63  ;;  %v737_v2 = vadd.f32 %v736_v1, %v547_v58  ;;  %v813_v63 = vpop.permute.xlu1 %812 }
 0x280   : > { %v1090_v4 = vpop.eup %1089  ;;  %1109 = vtanh.f32 %v735_v3 }
 0x281   : > { %v1092_v7 = vpop.eup %1091  ;;  %1111 = vtanh.f32 %v737_v2  ;;  %v763_v14 = vmul.f32 %v1090_v4, %v753_v10 }
 0x282   : > { %v1094_v5 = vpop.eup %1093  ;;  %v764_v17 = vmul.f32 %v1092_v7, %v753_v10 }
 0x283   : > { %v1096_v11 = vpop.eup %1095  ;;  %v765_v20 = vmul.f32 %v1094_v5, %v753_v10 }
 0x284   : > { %v1098_v12 = vpop.eup %1097  ;;  %v766_v24 = vmul.f32 %v1096_v11, %v753_v10  ;;  %v830_v11 = vsub.s32 %v827_v62, %v1289_v9 }
 0x285   : > { %v1100_v13 = vpop.eup %1099  ;;  %v767_v15 = vmul.f32 %v1098_v12, %v757_v0 }
 0x286   : > { %v1102_v16 = vpop.eup %1101  ;;  %v768_v18 = vmul.f32 %v1100_v13, %v757_v0 }
 0x287   : > { %v1104_v19 = vpop.eup %1103  ;;  %v769_v21 = vmul.f32 %v1102_v16, %v757_v0  ;;  %v775_v22 = vadd.f32 %v767_v15, %v763_v14 }
 0x288   : > { %v1106_v23 = vpop.eup %1105  ;;  %v770_v25 = vmul.f32 %v1104_v19, %v757_v0  ;;  %v784_v26 = vadd.f32 %v768_v18, %v764_v17 }
 0x289   : > { %v1108_v31 = vpop.eup %1107  ;;  %v793_v37 = vadd.f32 %v769_v21, %v765_v20  ;;  %v771_v38 = vmul.f32 %v1106_v23, %v761_v27 }
 0x28a   : > { %v1110_v39 = vpop.eup %1109  ;;  %v802_v40 = vadd.f32 %v770_v25, %v766_v24  ;;  %v772_v32 = vmul.f32 %v1108_v31, %v761_v27 }
 0x28b   : > { %v1112_v34 = vpop.eup %1111  ;;  %v773_v35 = vmul.f32 %v1110_v39, %v761_v27  ;;  %v776_v28 = vsel %vm346_vm0, %v771_v38, 0.0 }
 0x28c   : > { %v774_v29 = vmul.f32 %v1112_v34, %v761_v27  ;;  %v777_v30 = vadd.f32 %v776_v28, %v775_v22  ;;  %v785_v33 = vsel %vm346_vm0, %v772_v32, 0.0 }
 0x28d   : > { %v786_v36 = vadd.f32 %v785_v33, %v784_v26  ;;  %v794_v41 = vsel %vm346_vm0, %v773_v35, 0.0 }
 0x28e   : > { %v778_v42 = vrot.slane %v777_v30, 4  ;;  %v795_v43 = vadd.f32 %v794_v41, %v793_v37  ;;  %v803_v44 = vsel %vm346_vm0, %v774_v29, 0.0 }
 0x28f   : > { %v787_v45 = vrot.slane %v786_v36, 4  ;;  %v804_v46 = vadd.f32 %v803_v44, %v802_v40 }
 0x290   : > { %v796_v47 = vrot.slane %v795_v43, 4  ;;  %v779_v48 = vadd.f32 %v778_v42, %v777_v30 }
 0x291   : > { %v805_v49 = vrot.slane %v804_v46, 4  ;;  %v788_v50 = vadd.f32 %v787_v45, %v786_v36 }
 0x292   : > { %v780_v51 = vrot.slane %v779_v48, 2  ;;  %v797_v52 = vadd.f32 %v796_v47, %v795_v43 }
 0x293   : > { %v789_v54 = vrot.slane %v788_v50, 2  ;;  %v806_v55 = vadd.f32 %v805_v49, %v804_v46 }
 0x294   : > { %v781_v56 = vadd.f32 %v780_v51, %v779_v48  ;;  %v798_v57 = vrot.slane %v797_v52, 2 }
 0x295   : > { %v790_v58 = vadd.f32 %v789_v54, %v788_v50  ;;  %v807_v59 = vrot.slane %v806_v55, 2 }
 0x296   : > { %v782_v60 = vrot.slane %v781_v56, 1  ;;  %v799_v61 = vadd.f32 %v798_v57, %v797_v52 }
 0x297   : > { %v791_v3 = vrot.slane %v790_v58, 1  ;;  %v808_v1 = vadd.f32 %v807_v59, %v806_v55 }
 0x298   : > { %v783_v2 = vadd.f32 %v782_v60, %v781_v56  ;;  %v800_v4 = vrot.slane %v799_v61, 1 }
 0x299   : > { %v792_v7 = vadd.f32 %v791_v3, %v790_v58  ;;  %v809_v5 = vrot.slane %v808_v1, 1 }
 0x29a   : > { %v801_v10 = vadd.f32 %v800_v4, %v799_v61  ;;  %v815_v0 = vadd.f32 %v813_v63, %v783_v2 }
 0x29b   : > { %v810_v12 = vadd.f32 %v809_v5, %v808_v1  ;;  %v816_v13 = vadd.f32 %v813_v63, %v792_v7 }
 0x29c   : > { %v817_v14 = vadd.f32 %v813_v63, %v801_v10 }
 0x29d   : > { %v818_v15 = vadd.f32 %v813_v63, %v810_v12  ;;  %v823_v16 = vcombine.low %v815_v0, %v816_v13 }
 0x29f   : > { %v824_v17 = vcombine.low %v817_v14, %v818_v15  ;;  %v831_v18 = vrot.slane %v823_v16, %v830_v11 }
 0x2a1   : > { %v838_v19 = vrot.slane %v824_v17, %v830_v11 }
 0x2a3   : > { %v839_v20 = vcombine.low %v831_v18, %v838_v19 }
 0x2a5   : > { %v846_v21 = vrot.slane %v839_v20, %v830_v11 }
 0x2a7   : > { %852 = vst.msk [vmem:[%s137_s14] sm:$0xf] %vm850_vm2, %v846_v21 }
 0x2a8   : > { %1126 = shalt.err (!%p1123_p3)
}
 0x2a9   : > { %s1127_s27 = scalar_lea.hbm %s1350_s22, 64  ;;  %s1131_s30 = scalar_lea.hbm %s1394_s2, 128 }
 0x2aa   : > { %p1128_p4 = scmp.ne.s32.totalorder %s1350_s22, %s1127_s27  ;;  %p1132_p9 = scmp.lt.u32.totalorder %s1350_s22, %s1394_s2 }
 0x2ab   : > { %p1133_p10 = scmp.lt.u32.totalorder %s1131_s30, %s1127_s27  ;;  %p1135_p12 = scmp.lt.u32.totalorder %s1127_s27, %s1350_s22 }
 0x2ac   : > { %p1129_p7 = pnand %p1128_p4, %p1242_p5 }
 0x2ad   : > { %p1134_p11 = por %p1133_p10, %p1132_p9 }
 0x2ae   : > { %p1130_p8 = pneg %p1129_p7 }
 0x2af   : > { %p1136_p13 = por %p1135_p12, %p1134_p11 }
 0x2b1   : > { %p1137_p0 = pnand %p1136_p13, %p1130_p8 }
 0x2b3   : > { %1140 = shalt.err (!%p1137_p0)
}
 0x2b4   : > { %976 = dma.vmem_to_hbm [thread:$0]  (%p1242_p5), %s1352_s16, 64, %s1350_s22, %s854_s23  }
 0x2b5 PF: > { %p982_p1 = scmp.ge.s32.totalorder %s1175_s12, 2  ;;  %s880_s5 = sand.u32 1, %s1163_s9  }
 0x2b6   : > { %s881_s6 = scalar_lea.sflag [#allocation3], %s880_s5 }
 0x2b7   : > { %p979_p2 = pnand %p982_p1, %p1246_p6 }
 0x2b9   : > { %1158 = dma.done.wait (!%p979_p2), %s881_s6, 64  }
 0x2ba   : > { %1160 = vsyncadd (!%p979_p2), %s881_s6, 4294967232  ;;  %p12_p3 = scmp.ge.s32.totalorder %s1229_s15, 4   ;;  %s1397_s9 = smov %s1167_s10 }
 0x2bb   : > { %s1398_s10 = smov %s1171_s11  ;;  %s1399_s11 = smov %s1240_s18 }
 0x2bc   : > { %s1400_s12 = smov %s1229_s15  ;;  %14 = sbr.rel (!%p12_p3) target bundleno = 3 (0x3), region = 63 }
 0x2c3   :  { %886 = vsyncpa [#allocation3], 1 }
 0x2c4   :  { %888 = vsyncpa [#allocation3 + $0x1], 1 }

</bundles_post_ra>
